<compile_context>
chip_gen: v5e
topology: v5e:2x2
jax: 0.10.0
libtpu: 0.0.40
codegen_flags: <defaults>
</compile_context>

<pallas_src>
import math
import jax
import jax.numpy as jnp
from jax.experimental import pallas as pl
from jax.experimental.pallas import tpu as pltpu


# --------------------------------------------------------------------------
# Pallas kernels
# --------------------------------------------------------------------------
def _lcn_fused_kernel(patch_ref, w1_ref, b1_ref, w2_ref, b2_ref, out_ref):
    """LC multiply-reduce + bias + ReLU + decoder Linear, fully fused (C == 1).

    patch_ref : (TB, K, FPC)  patches, pre-tiled over filters along lanes
    w1_ref    : (K, FPC)      LC weights, lane index j = f*PC + q
    b1_ref    : (1, FPC)      LC bias
    w2_ref    : (D, Opad)     decoder weight (D = F*P), zero-padded lanes
    b2_ref    : (1, Opad)     decoder bias, zero-padded
    out_ref   : (TB, Opad)
    """
    # Elementwise multiply with K on sublanes and F*PC on lanes: the temp is
    # the same size as the patch block (no B*F blow-up), vregs are full.
    prod = patch_ref[...] * w1_ref[...][None, :, :]          # (TB, K, FPC)
    lc = jnp.sum(prod, axis=1)                               # (TB, FPC) sublane reduce
    lc = jnp.maximum(lc + b1_ref[...], 0.0)                  # bias + ReLU
    # Decoder Linear fused in: feat == lc for C == 1.  Opad = 128-multiple so
    # the store is unmasked; extra columns are zero (zero-padded weight/bias).
    out_ref[...] = (jnp.dot(lc, w2_ref[...],
                            preferred_element_type=jnp.float32)
                    + b2_ref[...])


def _lc_relu_kernel(patch_ref, w1_ref, b1_ref, out_ref):
    """LC + bias + ReLU only, lane-dense (B, F*PC) output (general-C path)."""
    prod = patch_ref[...] * w1_ref[...][None, :, :]          # (B, K, FPC)
    out_ref[...] = jnp.maximum(jnp.sum(prod, axis=1) + b1_ref[...], 0.0)


def _linear_kernel(x_ref, w_ref, b_ref, o_ref):
    o_ref[...] = (jnp.dot(x_ref[...], w_ref[...],
                          preferred_element_type=jnp.float32)
                  + b_ref[...])


def _vmem():
    return pl.BlockSpec(memory_space=pltpu.MemorySpace.VMEM)


def lcn_fused(patches_t, w1, b1, w2, b2):
    B, K, FPC = patches_t.shape
    D, Opad = w2.shape
    TB = B if B <= 128 else 128                     # full batch, or 8/128-aligned tile
    grid = (pl.cdiv(B, TB),)
    return pl.pallas_call(
        _lcn_fused_kernel,
        out_shape=jax.ShapeDtypeStruct((B, Opad), jnp.float32),
        grid_spec=pltpu.PrefetchScalarGridSpec(
            num_scalar_prefetch=0,
            grid=grid,
            in_specs=[
                pl.BlockSpec((TB, K, FPC), lambda i: (i, 0, 0)),
                pl.BlockSpec((K, FPC), lambda i: (0, 0)),
                pl.BlockSpec((1, FPC), lambda i: (0, 0)),
                pl.BlockSpec((D, Opad), lambda i: (0, 0)),
                pl.BlockSpec((1, Opad), lambda i: (0, 0)),
            ],
            out_specs=pl.BlockSpec((TB, Opad), lambda i: (i, 0)),
        ),
        compiler_params=pltpu.CompilerParams(
            dimension_semantics=("parallel",),
            vmem_limit_bytes=32 * 1024 * 1024,
        ),
    )(patches_t, w1, b1, w2, b2)


def lc_relu(patches_t, w1, b1):
    B = patches_t.shape[0]
    FPC = w1.shape[1]
    return pl.pallas_call(
        _lc_relu_kernel,
        out_shape=jax.ShapeDtypeStruct((B, FPC), jnp.float32),
        in_specs=[_vmem(), _vmem(), _vmem()],
        out_specs=_vmem(),
    )(patches_t, w1, b1)


def linear(x, w, b):
    N = x.shape[0]
    Opad = w.shape[1]
    return pl.pallas_call(
        _linear_kernel,
        out_shape=jax.ShapeDtypeStruct((N, Opad), jnp.float32),
        in_specs=[_vmem(), _vmem(), _vmem()],
        out_specs=_vmem(),
    )(x, w, b)


# --------------------------------------------------------------------------
# Glue: shapes, patch extraction, parameter init / layout prep
# --------------------------------------------------------------------------
def conv_output_shape(h_w, kernel_size, stride, padding=0):
    h = (h_w[0] + 2 * padding - kernel_size) // stride + 1
    w = (h_w[1] + 2 * padding - kernel_size) // stride + 1
    return h, w


def extract_patches(x, kh, kw, dh, dw):
    # x: (B, C, H, W) -> (B, C, Hs, Ws, kh, kw); mirrors torch .unfold(2,..).unfold(3,..)
    B, C, H, W = x.shape
    Hs = (H - kh) // dh + 1
    Ws = (W - kw) // dw + 1
    if dh == kh and dw == kw and H == Hs * kh and W == Ws * kw:
        # Non-overlapping exact tiling: pure reshape + transpose, no gather.
        return x.reshape(B, C, Hs, kh, Ws, kw).transpose(0, 1, 2, 4, 3, 5)
    # TODO(synk): for large overlapping-patch images, extract patches inside the
    # kernel via strided pl.ds reads instead of this XLA gather.
    rows = (jnp.arange(Hs) * dh)[:, None] + jnp.arange(kh)[None, :]   # (Hs, kh)
    cols = (jnp.arange(Ws) * dw)[:, None] + jnp.arange(kw)[None, :]   # (Ws, kw)
    return x[:, :, rows[:, None, :, None], cols[None, :, None, :]]


def init_lcn_params(key, in_channels, h, w, nfilters, kernel_size, stride, out_channels):
    # Deterministic synthetic init (kaiming_uniform-style bounds, torch param shapes).
    Hs, Ws = conv_output_shape((h, w), kernel_size, stride)
    P = Hs * Ws
    k1, k2, k3, k4 = jax.random.split(key, 4)
    fan_in = in_channels * kernel_size * kernel_size
    bound_w = math.sqrt(6.0 / ((1.0 + 5.0) * fan_in))     # a = sqrt(5)
    w_lc = jax.random.uniform(k1, (P * nfilters, in_channels, kernel_size, kernel_size),
                              jnp.float32, -bound_w, bound_w)
    bound_b = 1.0 / math.sqrt(fan_in)
    b_lc = jax.random.uniform(k2, (P * nfilters, in_channels),
                              jnp.float32, -bound_b, bound_b)
    D = Hs * Ws * nfilters
    bound_fc = 1.0 / math.sqrt(D)
    w_fc = jax.random.uniform(k3, (out_channels, D), jnp.float32, -bound_fc, bound_fc)
    b_fc = jax.random.uniform(k4, (out_channels,), jnp.float32, -bound_fc, bound_fc)
    return dict(w_lc=w_lc, b_lc=b_lc, w_fc=w_fc, b_fc=b_fc, Hs=Hs, Ws=Ws)


def prepare_lcn_params(params, in_channels, nfilters, kernel_size, out_channels):
    """One-time re-layout of raw (torch-shaped) params into kernel-ready slabs."""
    Hs, Ws = params["Hs"], params["Ws"]
    P = Hs * Ws
    C = in_channels
    F = nfilters
    K = kernel_size * kernel_size
    PC = P * C
    # LC weight (F*P, C, kh, kw) -> (K, F*PC): w1[k, f*PC + p*C + c] = w[f*P+p, c, kh, kw]
    w5 = params["w_lc"].reshape(F, P, C, kernel_size, kernel_size)
    w1 = w5.transpose(3, 4, 0, 1, 2).reshape(K, F * PC).astype(jnp.float32)
    # LC bias (F*P, C) -> (1, F*PC) with the same lane ordering.
    b1 = params["b_lc"].reshape(1, F * PC).astype(jnp.float32)
    # Decoder (O, D) -> (D, Opad): transpose + zero-pad O up to a 128-lane tile,
    # done once here (no per-forward .T, lane-dense weight load along D).
    D = F * P
    O = out_channels
    Opad = ((O + 127) // 128) * 128
    w2 = jnp.zeros((D, Opad), jnp.float32).at[:, :O].set(params["w_fc"].T)
    b2 = jnp.zeros((1, Opad), jnp.float32).at[:, :O].set(params["b_fc"][None, :])
    return dict(w1=w1, b1=b1, w2=w2, b2=b2, Hs=Hs, Ws=Ws,
                C=C, F=F, P=P, K=K, O=O, Opad=Opad)


def lcn_forward(prep, x, kernel_size, stride):
    # LCN with scalar nfilters, hidden=None, invar_reduction=None,
    # readout_activation=None, activation='relu', padding=0.
    B, C, H, W = x.shape
    kh = kw = kernel_size
    F, P, K = prep["F"], prep["P"], prep["K"]
    Hs, Ws = prep["Hs"], prep["Ws"]
    PC = P * C

    # -- Conv2d_Local patch prep (mirrors torch unfold + reshape chain) --
    p = extract_patches(x, kh, kw, stride, stride)          # (B, C, Hs, Ws, kh, kw)
    p = p.reshape(B, -1, C, kh, kw)                         # (B, P, C, kh, kw)
    patches = p.reshape(B, PC, K).astype(jnp.float32)       # q = p*C + c, k = i*kw + j
    patches_t = jnp.transpose(patches, (0, 2, 1))           # (B, K, PC): K -> sublanes
    # Tile over filters along the lane axis so lane j = f*PC + q matches w1/b1.
    # TODO(synk): for large F, replicate inside the kernel to avoid F x HBM reads.
    patches_t = jnp.tile(patches_t, (1, 1, F))              # (B, K, F*PC)

    if C == 1:
        # Fully fused: LC + bias + ReLU + decoder in one pallas_call.
        out = lcn_fused(patches_t, prep["w1"], prep["b1"], prep["w2"], prep["b2"])
        return out[:, :prep["O"]]

    # General-C fallback (torch's reshape chain scrambles (f,p,c) -> (n,f,hs,ws),
    # so the decoder can't be fused without an in-kernel relayout).
    lc = lc_relu(patches_t, prep["w1"], prep["b1"])          # (B, F*PC) lane-dense
    z = lc.reshape(B, F * P, C).reshape(-1, F, Hs, Ws)       # mirror torch .view
    feat = z.reshape(z.shape[0], -1)                         # (B*C, F*Hs*Ws)
    out = linear(feat, prep["w2"], prep["b2"])
    return out[:, :prep["O"]]


# --------------------------------------------------------------------------
# Pure-JAX reference (direct transliteration of the PyTorch forward).
# --------------------------------------------------------------------------
def lcn_reference(params, x, nfilters, kernel_size, stride):
    B, C, H, W = x.shape
    kh = kw = kernel_size
    Hs, Ws = params["Hs"], params["Ws"]
    p = extract_patches(x, kh, kw, stride, stride)
    p = p.reshape(B, -1, C, kh, kw)
    p = jnp.tile(p, (1, nfilters, 1, 1, 1))
    z = (p * params["w_lc"][None]).sum(axis=(-1, -2)) + params["b_lc"][None]
    z = z.reshape(-1, nfilters, Hs, Ws)
    z = jnp.maximum(z, 0.0)
    feat = z.reshape(z.shape[0], -1)
    return feat @ params["w_fc"].T + params["b_fc"][None]


if __name__ == "__main__":
    # Config 1 (default in_channels=1, fused path): B=2, 16x16 image,
    # kernel_size=stride=4 -> 4x4 grid of local patches, nfilters=8, out=10.
    B, C, H, W = 2, 1, 16, 16
    nfilters, kernel_size, stride, out_channels = 8, 4, 4, 10

    key = jax.random.PRNGKey(0)
    kx, kp, kx2, kp2 = jax.random.split(key, 4)

    x = jax.random.normal(kx, (B, C, H, W), jnp.float32)
    params = init_lcn_params(kp, C, H, W, nfilters, kernel_size, stride, out_channels)
    prep = prepare_lcn_params(params, C, nfilters, kernel_size, out_channels)

    out = jax.block_until_ready(lcn_forward(prep, x, kernel_size, stride))
    ref = lcn_reference(params, x, nfilters, kernel_size, stride)
    assert out.shape == (B, out_channels), out.shape
    assert jnp.allclose(out, ref, atol=1e-4, rtol=1e-4), (
        "Pallas LCN (fused, C=1) output mismatch vs reference")

    # Config 2 (in_channels=2, non-fused fallback path) — covers the C>1
    # reshape-chain concern from the review.
    C2 = 2
    x2 = jax.random.normal(kx2, (B, C2, H, W), jnp.float32)
    params2 = init_lcn_params(kp2, C2, H, W, nfilters, kernel_size, stride, out_channels)
    prep2 = prepare_lcn_params(params2, C2, nfilters, kernel_size, out_channels)

    out2 = jax.block_until_ready(lcn_forward(prep2, x2, kernel_size, stride))
    ref2 = lcn_reference(params2, x2, nfilters, kernel_size, stride)
    assert out2.shape == (B * C2, out_channels), out2.shape
    assert jnp.allclose(out2, ref2, atol=1e-4, rtol=1e-4), (
        "Pallas LCN (C=2 fallback) output mismatch vs reference")

    print("KERNEL_OK")
</pallas_src>

<mosaic_0001>
module attributes {stable_mosaic.version = 11 : i64} {
  func.func @_lcn_fused_kernel(%arg0: i32, %arg1: memref<2x16x128xf32, #tpu.memory_space<vmem>>, %arg2: memref<16x128xf32, #tpu.memory_space<vmem>>, %arg3: memref<1x128xf32, #tpu.memory_space<vmem>>, %arg4: memref<128x128xf32, #tpu.memory_space<vmem>>, %arg5: memref<1x128xf32, #tpu.memory_space<vmem>>, %arg6: memref<2x128xf32, #tpu.memory_space<vmem>>) attributes {dimension_semantics = [#tpu.dimension_semantics<parallel>], iteration_bounds = array<i64: 1>, scalar_prefetch = 0 : i64, scratch_operands = 0 : i64, tpu.core_type = #tpu.core_type<tc>, window_params = [{transform_indices = @transform_0, window_bounds = array<i64: 2, 16, 128>}, {pipeline_mode = #tpu.pipeline_mode<synchronous>, transform_indices = @transform_1, window_bounds = array<i64: 16, 128>}, {pipeline_mode = #tpu.pipeline_mode<synchronous>, transform_indices = @transform_2, window_bounds = array<i64: 1, 128>}, {pipeline_mode = #tpu.pipeline_mode<synchronous>, transform_indices = @transform_3, window_bounds = array<i64: 128, 128>}, {pipeline_mode = #tpu.pipeline_mode<synchronous>, transform_indices = @transform_4, window_bounds = array<i64: 1, 128>}, {transform_indices = @transform_5, window_bounds = array<i64: 2, 128>}]} {
    %c0 = arith.constant 0 : index
    %c0_0 = arith.constant 0 : index
    %c0_1 = arith.constant 0 : index
    %0 = vector.load %arg1[%c0, %c0_0, %c0_1] : memref<2x16x128xf32, #tpu.memory_space<vmem>>, vector<2x16x128xf32>
    %c0_2 = arith.constant 0 : index
    %c0_3 = arith.constant 0 : index
    %1 = vector.load %arg2[%c0_2, %c0_3] : memref<16x128xf32, #tpu.memory_space<vmem>>, vector<16x128xf32>
    %2 = vector.shape_cast %1 : vector<16x128xf32> to vector<1x16x128xf32>
    %3 = vector.broadcast %2 : vector<1x16x128xf32> to vector<2x16x128xf32>
    %4 = arith.mulf %0, %3 : vector<2x16x128xf32>
    %cst = arith.constant dense<0.000000e+00> : vector<2x128xf32>
    %5 = vector.multi_reduction <add>, %4, %cst [1] : vector<2x16x128xf32> to vector<2x128xf32>
    %c0_4 = arith.constant 0 : index
    %c0_5 = arith.constant 0 : index
    %6 = vector.load %arg3[%c0_4, %c0_5] : memref<1x128xf32, #tpu.memory_space<vmem>>, vector<1x128xf32>
    %7 = vector.broadcast %6 : vector<1x128xf32> to vector<2x128xf32>
    %8 = arith.addf %5, %7 : vector<2x128xf32>
    %cst_6 = arith.constant 0.000000e+00 : f32
    %9 = vector.broadcast %cst_6 : f32 to vector<2x128xf32>
    %10 = arith.maximumf %8, %9 : vector<2x128xf32>
    %c0_7 = arith.constant 0 : index
    %c0_8 = arith.constant 0 : index
    %11 = vector.load %arg4[%c0_7, %c0_8] : memref<128x128xf32, #tpu.memory_space<vmem>>, vector<128x128xf32>
    %cst_9 = arith.constant dense<0.000000e+00> : vector<2x128xf32>
    %12 = tpu.matmul %10, %11, %cst_9 {dimension_numbers = #tpu.dot_dimension_numbers<[1], [0], [0], [1], [0, 0, 1, 1], [], []>} : vector<2x128xf32>, vector<128x128xf32>, vector<2x128xf32> -> vector<2x128xf32>
    %c0_10 = arith.constant 0 : index
    %c0_11 = arith.constant 0 : index
    %13 = vector.load %arg5[%c0_10, %c0_11] : memref<1x128xf32, #tpu.memory_space<vmem>>, vector<1x128xf32>
    %14 = vector.broadcast %13 : vector<1x128xf32> to vector<2x128xf32>
    %15 = arith.addf %12, %14 : vector<2x128xf32>
    %c0_12 = arith.constant 0 : index
    %c0_13 = arith.constant 0 : index
    %16 = vector.load %arg6[%c0_12, %c0_13] : memref<2x128xf32, #tpu.memory_space<vmem>>, vector<2x128xf32>
    tpu.vector_store %arg6[%c0_12, %c0_13], %15 {strides = array<i32>} : memref<2x128xf32, #tpu.memory_space<vmem>>, vector<2x128xf32>,
    return
  }
  func.func @transform_0(%arg0: i32) -> (i32, i32, i32) {
    %c0_i32 = arith.constant 0 : i32
    %c0_i32_0 = arith.constant 0 : i32
    %c0_i32_1 = arith.constant 0 : i32
    return %arg0, %c0_i32, %c0_i32_0 : i32, i32, i32
  }
  func.func @transform_1(%arg0: i32) -> (i32, i32) {
    %c0_i32 = arith.constant 0 : i32
    %c0_i32_0 = arith.constant 0 : i32
    %c0_i32_1 = arith.constant 0 : i32
    return %c0_i32, %c0_i32_0 : i32, i32
  }
  func.func @transform_2(%arg0: i32) -> (i32, i32) {
    %c0_i32 = arith.constant 0 : i32
    %c0_i32_0 = arith.constant 0 : i32
    %c0_i32_1 = arith.constant 0 : i32
    return %c0_i32, %c0_i32_0 : i32, i32
  }
  func.func @transform_3(%arg0: i32) -> (i32, i32) {
    %c0_i32 = arith.constant 0 : i32
    %c0_i32_0 = arith.constant 0 : i32
    %c0_i32_1 = arith.constant 0 : i32
    return %c0_i32, %c0_i32_0 : i32, i32
  }
  func.func @transform_4(%arg0: i32) -> (i32, i32) {
    %c0_i32 = arith.constant 0 : i32
    %c0_i32_0 = arith.constant 0 : i32
    %c0_i32_1 = arith.constant 0 : i32
    return %c0_i32, %c0_i32_0 : i32, i32
  }
  func.func @transform_5(%arg0: i32) -> (i32, i32) {
    %c0_i32 = arith.constant 0 : i32
    %c0_i32_0 = arith.constant 0 : i32
    return %arg0, %c0_i32 : i32, i32
  }
}

</mosaic_0001>

<bundles_post_ra>
// kernel: tpu_custom_call.1
= control target key start
LH: loop header
LB: loop body
LE: loop exit
PB: predicated region body
PF: predicated region fallthrough
CT: control target
= control target key end

     0   :  { %10 = vsyncpa [#allocation3], 0  ;;  %s329_s0 = inlined_call_operand.hbm [shape: f32[2,16,128], index: 0, kind: input, shape index: {}]   ;;  %s330_s1 = inlined_call_operand.hbm [shape: f32[16,128], index: 1, kind: input, shape index: {}]   ;;  %s331_s2 = inlined_call_operand.vmem [shape: f32[1,128], index: 2, kind: input, shape index: {}]   ;;  %s332_s3 = inlined_call_operand.hbm [shape: f32[128,128], index: 3, kind: input, shape index: {}]   ;;  %s333_s4 = inlined_call_operand.vmem [shape: f32[1,128], index: 4, kind: input, shape index: {}]   ;;  %s334_s5 = inlined_call_operand.hbm [shape: f32[2,128], index: 5, kind: output, shape index: {}]  }
   0x1   :  { %11 = vsyncpa [#allocation6], 0 }
   0x2   :  { %12 = vsyncpa [#allocation4], 0  ;;  %s30_s20 = sshll.u32 %s330_s1, 4  ;;  %s275_s21 = smov [#allocation5]   ;;  %s31_s20 = int_to_ptr.hbm [resolvable:$true] %s30_s20 }
   0x3   :  { %s32_s22 = sshll.u32 %s275_s21, 4  ;;  %s17_s25 = sshll.u32 %s329_s0, 4  ;;  %s33_s22 = int_to_ptr.vmem [resolvable:$true] %s32_s22  ;;  %s18_s25 = int_to_ptr.hbm [resolvable:$true] %s17_s25 }
   0x4   :  { %s276_s26 = smov 128   ;;  %s277_s27 = smov 8  }
   0x5   :  { %38 = dma.hbm_to_vmem [thread:$0]  %s31_s20, 256, %s33_s22, [#allocation6], %s276_s26, %s276_s26, %s277_s27  }
   0x6   :  { %s278_s28 = smov [#allocation2]   ;;  %s45_s7 = sshll.u32 %s332_s3, 4  ;;  %s46_s7 = int_to_ptr.hbm [resolvable:$true] %s45_s7 }
   0x7   :  { %s19_s29 = sshll.u32 %s278_s28, 4  ;;  %s279_s1 = smov [#allocation7]   ;;  %s20_s29 = int_to_ptr.vmem [resolvable:$true] %s19_s29 }
   0x8   :  { %25 = dma.hbm_to_vmem [thread:$0]  %s18_s25, 512, %s20_s29, [#allocation3], %s276_s26, %s276_s26, %s277_s27  }
   0x9   :  { %s47_s8 = sshll.u32 %s279_s1, 4  ;;  %s48_s8 = int_to_ptr.vmem [resolvable:$true] %s47_s8 }
   0xa   :  { %53 = dma.hbm_to_vmem [thread:$0]  %s46_s7, 2048, %s48_s8, [#allocation6], %s276_s26, %s276_s26, %s277_s27  }
   0xb   :  { %269 = dma.done.wait [#allocation3], 512  }
   0xc   :  { %270 = vsyncadd [#allocation3], 4294966784 }
   0xd   :  { %271 = dma.done.wait [#allocation6], 2304  }
   0xe   :  { %272 = vsyncadd [#allocation6], 4294964992  ;;  %v115_v0 = vld [vmem:[#allocation7 + $0x78] sm:$0xff]  ;;  %v114_v1 = vld [vmem:[#allocation7 + $0x70] sm:$0xff]  ;;  %vm123_vm0 = vcmask 1041409   ;;  %s280_s10 = smov [#allocation8]  }
   0xf   :  { %126 = vmatpush.msra.mxu0 %v115_v0  ;;  %v113_v2 = vld [vmem:[#allocation7 + $0x68] sm:$0xff]  ;;  %v112_v3 = vld [vmem:[#allocation7 + $0x60] sm:$0xff]  ;;  %v111_v4 = vld [vmem:[#allocation7 + $0x58] sm:$0xff]  ;;  %s152_s11 = sshll.u32 %s280_s10, 4  ;;  %s154_s14 = sshll.u32 %s334_s5, 4  ;;  %s153_s11 = int_to_ptr.vmem [resolvable:$true] %s152_s11  ;;  %s155_s14 = int_to_ptr.hbm [resolvable:$true] %s154_s14 }
  0x10   :  { %v68_v5 = vld [vmem:[#allocation2] sm:$0xff]  ;;  %v69_v6 = vld [vmem:[#allocation2 + $0x8] sm:$0xff]  ;;  %v70_v7 = vld [vmem:[#allocation2 + $0x10] sm:$0xff] }
  0x11   :  { %127 = vmatpush.msra.mxu0 %v114_v1  ;;  %v71_v8 = vld [vmem:[#allocation2 + $0x18] sm:$0xff]  ;;  %v72_v9 = vld [vmem:[#allocation5] sm:$0xff]  ;;  %v73_v10 = vld [vmem:[#allocation5 + $0x8] sm:$0xff] }
  0x12   :  { %v74_v11 = vmul.f32 %v72_v9, %v68_v5  ;;  %v76_v12 = vmul.f32 %v72_v9, %v70_v7  ;;  %v110_v13 = vld [vmem:[#allocation7 + $0x50] sm:$0xff]  ;;  %v75_v14 = vmul.f32 %v73_v10, %v69_v6  ;;  %v77_v15 = vmul.f32 %v73_v10, %v71_v8  ;;  %v109_v16 = vld [vmem:[#allocation7 + $0x48] sm:$0xff]  ;;  %v108_v19 = vld [vmem:[#allocation7 + $0x40] sm:$0xff] }
  0x13   :  { %128 = vmatpush.msra.mxu0 %v113_v2  ;;  %v107_v22 = vld [vmem:[#allocation7 + $0x38] sm:$0xff]  ;;  %v106_v25 = vld [vmem:[#allocation7 + $0x30] sm:$0xff]  ;;  %v105_v28 = vld [vmem:[#allocation7 + $0x28] sm:$0xff] }
  0x14   :  { %v78_v17 = vadd.f32 %v75_v14, %v74_v11  ;;  %v85_v18 = vadd.f32 %v77_v15, %v76_v12  ;;  %v104_v31 = vld [vmem:[#allocation7 + $0x20] sm:$0xff]  ;;  %v171_v34 = vld [vmem:[%s331_s2] ss:$0 sm:$0xff]  ;;  %v103_v35 = vld [vmem:[#allocation7 + $0x18] sm:$0xff] }
  0x15   :  { %129 = vmatpush.msra.mxu0 %v112_v3  ;;  %v102_v38 = vld [vmem:[#allocation7 + $0x10] sm:$0xff]  ;;  %v101_v41 = vld [vmem:[#allocation7 + $0x8] sm:$0xff]  ;;  %v100_v44 = vld [vmem:[#allocation7] sm:$0xff] }
  0x16   :  { %v79_v20 = vrot.slane %v78_v17, 4  ;;  %v86_v21 = vrot.slane %v85_v18, 4  ;;  %v172_v47 = vld [vmem:[%s333_s4] ss:$0 sm:$0xff] }
  0x17   :  { %130 = vmatpush.msra.mxu0 %v111_v4 }
  0x18   :  { %v80_v23 = vadd.f32 %v79_v20, %v78_v17  ;;  %v87_v24 = vadd.f32 %v86_v21, %v85_v18 }
  0x19   :  { %131 = vmatpush.msra.mxu0 %v110_v13 }
  0x1a   :  { %v81_v26 = vrot.slane %v80_v23, 2  ;;  %v88_v27 = vrot.slane %v87_v24, 2 }
  0x1b   :  { %132 = vmatpush.msra.mxu0 %v109_v16 }
  0x1c   :  { %v82_v29 = vadd.f32 %v81_v26, %v80_v23  ;;  %v89_v30 = vadd.f32 %v88_v27, %v87_v24 }
  0x1d   :  { %133 = vmatpush.msra.mxu0 %v108_v19 }
  0x1e   :  { %v83_v32 = vrot.slane %v82_v29, 1  ;;  %v90_v33 = vrot.slane %v89_v30, 1 }
  0x1f   :  { %134 = vmatpush.msra.mxu0 %v107_v22 }
  0x20   :  { %v84_v36 = vadd.f32 %v83_v32, %v82_v29  ;;  %v91_v37 = vadd.f32 %v90_v33, %v89_v30 }
  0x21   :  { %135 = vmatpush.msra.mxu0 %v106_v25 }
  0x22   :  { %v96_v39 = vadd.f32 %v171_v34, %v84_v36  ;;  %v97_v40 = vadd.f32 %v171_v34, %v91_v37 }
  0x23   :  { %136 = vmatpush.msra.mxu0 %v105_v28 }
  0x24   :  { %v98_v42 = vmax.f32 %v96_v39, 0.0  ;;  %v99_v43 = vmax.f32 %v97_v40, 0.0 }
  0x25   :  { %137 = vmatpush.msra.mxu0 %v104_v31 }
  0x26   :  { %v122_v45 = vrot.slane %v99_v43, 7 }
  0x27   :  { %138 = vmatpush.msra.mxu0 %v103_v35 }
  0x28   :  { %v124_v46 = vsel %vm123_vm0, %v122_v45, %v98_v42 }
  0x29   :  { %139 = vmatpush.msra.mxu0 %v102_v38 }
  0x2b   :  { %140 = vmatpush.msra.mxu0 %v101_v41 }
  0x2d   :  { %141 = vmatpush.msra.mxu0 %v100_v44 }
  0x2e   :  { %142 = vmatmul.f32.vlgmr.msra.gmra.mxu0 %v124_v46 }
  0xab   :  { %v143_v48 = vpop.f32.mrf.mxu0 }
  0xac   :  { %v144_v49 = vadd.f32 %v172_v47, %v143_v48 }
  0xae   :  { %146 = vst [vmem:[#allocation8] sm:$0x3] %v144_v49 }
  0xaf   :  { %157 = dma.vmem_to_hbm [thread:$0]  %s153_s11, 32, %s155_s14, [#allocation4]  }
  0xb0   :  { %273 = dma.done.wait [#allocation4], 32  }
  0xb1   :  { %274 = vsyncadd [#allocation4], 4294967264 }
  0xb2   :  { %162 = vsyncpa [#allocation3], 1 }
  0xb3   :  { %163 = vsyncpa [#allocation6], 1 }
  0xb4   :  { %164 = vsyncpa [#allocation4], 1 }

</bundles_post_ra>
